<compile_context>
chip_gen: v7x
topology: tpu7x:2x2x1
jax: 0.10.0
libtpu: 0.0.40
codegen_flags: <defaults>
</compile_context>

<pallas_src>
import jax
import jax.numpy as jnp
from jax.experimental import pallas as pl
from jax.experimental.pallas import tpu as pltpu


# ----------------------------------------------------------------------------
# Flatten (metadata-only)
# ----------------------------------------------------------------------------
def flatten(feat: jax.Array) -> jax.Array:
    """Flatten.forward: (N, C, H, W) -> (N, C*H*W).  No Pallas kernel needed."""
    return feat.reshape(feat.shape[0], -1)


# ----------------------------------------------------------------------------
# Kernels
# ----------------------------------------------------------------------------
def _fc_kernel_accum_out(x_ref, w_ref, b_ref, o_ref):
    """out = x @ w + b, accumulated directly into the f32 output block.

    Grid = (n_tiles, out_tiles, k_tiles); k (axis 2) is the reduction axis.
    The output block index is constant across k, so o_ref stays VMEM-resident
    and is written back to HBM once after the k sweep.  No scratch needed.
    """
    k = pl.program_id(2)
    part = jnp.dot(x_ref[...], w_ref[...], preferred_element_type=jnp.float32)

    @pl.when(k == 0)
    def _():
        o_ref[...] = part + b_ref[...]

    @pl.when(k > 0)
    def _():
        o_ref[...] += part


def _fc_kernel_scratch(x_ref, w_ref, b_ref, o_ref, acc_ref):
    """Same matmul, but with an f32 scratch accumulator (non-f32 outputs)."""
    k = pl.program_id(2)

    @pl.when(k == 0)
    def _():
        acc_ref[...] = jnp.zeros_like(acc_ref)

    acc_ref[...] += jnp.dot(
        x_ref[...], w_ref[...], preferred_element_type=jnp.float32
    )

    @pl.when(k == pl.num_programs(2) - 1)
    def _():
        o_ref[...] = (acc_ref[...] + b_ref[...]).astype(o_ref.dtype)


# ----------------------------------------------------------------------------
# Tile selection
# ----------------------------------------------------------------------------
_MAX_TILE_N = 512
_W_BLOCK_BUDGET_BYTES = 8 * 1024 * 1024  # double-buffered weight block budget


def _round_up(x: int, m: int) -> int:
    return (x + m - 1) // m * m


def _pick_tile_n(n_pad: int) -> int:
    """Maximize the batch tile so the weight matrix is streamed fewest times."""
    if n_pad <= _MAX_TILE_N:
        return n_pad  # block equals the full array dim -> always legal
    for cand in (512, 256, 128, 64, 32, 16, 8):
        if n_pad % cand == 0:
            return cand
    return n_pad  # unreachable: n_pad is a multiple of 8


def _pick_tile_out(out_pad: int) -> int:
    for cand in (512, 256, 128):
        if out_pad % cand == 0:
            return cand
    return 128  # unreachable: out_pad is a multiple of 128


def _pick_tile_k(k_pad: int, tile_out: int, itemsize: int) -> int:
    """Whole K in one block when the double-buffered weight block fits the
    budget (small-problem fast path: no K re-accumulation), else tile K."""
    if 2 * k_pad * tile_out * itemsize <= _W_BLOCK_BUDGET_BYTES:
        return k_pad
    for cand in (1024, 512, 256, 128):
        if k_pad % cand == 0 and 2 * cand * tile_out * itemsize <= _W_BLOCK_BUDGET_BYTES:
            return cand
    return 128  # unreachable: k_pad is a multiple of 128


# ----------------------------------------------------------------------------
# fc_block wrapper
# ----------------------------------------------------------------------------
def fc_block(
    feat: jax.Array,
    w_t: jax.Array,
    b: jax.Array,
    *,
    compute_dtype=jnp.bfloat16,
) -> jax.Array:
    """AlexNet fc_block: Flatten + Linear.

    feat: (N, C, H, W) contiguous NCHW feature map.
    w_t : (K, OUT) weight, already transposed vs torch's (OUT, K) so the kernel
          computes x @ w_t (torch Linear is x @ W.T + b).
    b   : (OUT,) bias.
    Returns (N, OUT) in feat.dtype.
    """
    n = feat.shape[0]
    x2d = flatten(feat)                      # free: metadata-only reshape
    k_dim, out_dim = w_t.shape
    assert x2d.shape == (n, k_dim)
    out_dtype = feat.dtype

    # --- pad to lane-dense, (8,128)-aligned shapes; zeros don't change x@w ---
    k_pad = _round_up(k_dim, 128)
    out_pad = _round_up(out_dim, 128)
    n_pad = n if n <= _MAX_TILE_N else _round_up(n, 8)

    x_c = x2d.astype(compute_dtype)
    w_c = w_t.astype(compute_dtype)
    if (n_pad, k_pad) != (n, k_dim):
        x_c = jnp.pad(x_c, ((0, n_pad - n), (0, k_pad - k_dim)))
    if (k_pad, out_pad) != (k_dim, out_dim):
        w_c = jnp.pad(w_c, ((0, k_pad - k_dim), (0, out_pad - out_dim)))
    b2d = b.astype(jnp.float32).reshape(1, out_dim)
    if out_pad != out_dim:
        b2d = jnp.pad(b2d, ((0, 0), (0, out_pad - out_dim)))

    itemsize = jnp.dtype(compute_dtype).itemsize
    tile_n = _pick_tile_n(n_pad)
    tile_out = _pick_tile_out(out_pad)
    tile_k = _pick_tile_k(k_pad, tile_out, itemsize)

    grid = (n_pad // tile_n, out_pad // tile_out, k_pad // tile_k)

    in_specs = [
        pl.BlockSpec((tile_n, tile_k), lambda i, j, k: (i, k)),     # x
        pl.BlockSpec((tile_k, tile_out), lambda i, j, k: (k, j)),   # w_t
        pl.BlockSpec((1, tile_out), lambda i, j, k: (0, j)),        # bias
    ]
    out_spec = pl.BlockSpec((tile_n, tile_out), lambda i, j, k: (i, j))

    accum_into_out = out_dtype == jnp.float32
    kernel = _fc_kernel_accum_out if accum_into_out else _fc_kernel_scratch
    scratch = (
        []
        if accum_into_out
        else [pltpu.VMEM((tile_n, tile_out), jnp.float32)]
    )

    out = pl.pallas_call(
        kernel,
        out_shape=jax.ShapeDtypeStruct((n_pad, out_pad), out_dtype),
        grid_spec=pltpu.PrefetchScalarGridSpec(
            num_scalar_prefetch=0,
            grid=grid,
            in_specs=in_specs,
            out_specs=out_spec,
            scratch_shapes=scratch,
        ),
        compiler_params=pltpu.CompilerParams(
            dimension_semantics=("parallel", "parallel", "arbitrary"),
            vmem_limit_bytes=48 * 1024 * 1024,
        ),
    )(x_c, w_c, b2d)

    if (n_pad, out_pad) != (n, out_dim):
        out = out[:n, :out_dim]
    return out


# ----------------------------------------------------------------------------
# Demo / correctness check
# ----------------------------------------------------------------------------
if __name__ == "__main__":
    key = jax.random.PRNGKey(0)
    k_x, k_w, k_b = jax.random.split(key, 3)

    # Small shapes consistent with a conv feature map feeding the classifier:
    # batch=2, channels=4, 16x16 spatial -> K = 4*16*16 = 1024, low_dim = 128.
    N, C, H, W = 2, 4, 16, 16
    K = C * H * W
    LOW_DIM = 128

    x = jax.random.normal(k_x, (N, C, H, W), dtype=jnp.float32)
    w_t = jax.random.normal(k_w, (K, LOW_DIM), dtype=jnp.float32) * 0.02
    b = jax.random.normal(k_b, (LOW_DIM,), dtype=jnp.float32) * 0.02

    # Flatten semantics (torch .view(N, -1) on contiguous NCHW).
    flat = flatten(x)
    assert flat.shape == (N, K)
    assert jnp.array_equal(flat, x.reshape(N, -1)), "flatten order mismatch"

    # Fused Flatten + Linear via the Pallas kernel (bf16 inputs, f32 accum).
    out = fc_block(x, w_t, b)
    out = jax.block_until_ready(out)

    # Reference with matching numerics: bf16-rounded inputs, f32 accumulation.
    xb = flat.astype(jnp.bfloat16).astype(jnp.float32)
    wb = w_t.astype(jnp.bfloat16).astype(jnp.float32)
    ref = jnp.dot(xb, wb, precision=jax.lax.Precision.HIGHEST) + b

    assert out.shape == (N, LOW_DIM), out.shape
    assert out.dtype == x.dtype, out.dtype
    assert jnp.allclose(out, ref, rtol=1e-3, atol=1e-3), (
        "mismatch vs reference fc_block"
    )

    print("KERNEL_OK")
</pallas_src>

<mosaic_0001>
module attributes {stable_mosaic.version = 11 : i64} {
  func.func @_fc_kernel_accum_out(%arg0: i32, %arg1: i32, %arg2: i32, %arg3: memref<2x1024xbf16, #tpu.memory_space<vmem>>, %arg4: memref<1024x128xbf16, #tpu.memory_space<vmem>>, %arg5: memref<1x128xf32, #tpu.memory_space<vmem>>, %arg6: memref<2x128xf32, #tpu.memory_space<vmem>>) attributes {dimension_semantics = [#tpu.dimension_semantics<parallel>, #tpu.dimension_semantics<parallel>, #tpu.dimension_semantics<arbitrary>], iteration_bounds = array<i64: 1, 1, 1>, scalar_prefetch = 0 : i64, scratch_operands = 0 : i64, tpu.core_type = #tpu.core_type<tc>, window_params = [{transform_indices = @transform_0, window_bounds = array<i64: 2, 1024>}, {transform_indices = @transform_1, window_bounds = array<i64: 1024, 128>}, {transform_indices = @transform_2, window_bounds = array<i64: 1, 128>}, {transform_indices = @transform_3, window_bounds = array<i64: 2, 128>}]} {
    %c0 = arith.constant 0 : index
    %c0_0 = arith.constant 0 : index
    %0 = vector.load %arg3[%c0, %c0_0] : memref<2x1024xbf16, #tpu.memory_space<vmem>>, vector<2x1024xbf16>
    %c0_1 = arith.constant 0 : index
    %c0_2 = arith.constant 0 : index
    %1 = vector.load %arg4[%c0_1, %c0_2] : memref<1024x128xbf16, #tpu.memory_space<vmem>>, vector<1024x128xbf16>
    %cst = arith.constant dense<0.000000e+00> : vector<2x128xf32>
    %2 = tpu.matmul %0, %1, %cst {dimension_numbers = #tpu.dot_dimension_numbers<[1], [0], [0], [1], [0, 0, 1, 1], [], []>} : vector<2x1024xbf16>, vector<1024x128xbf16>, vector<2x128xf32> -> vector<2x128xf32>
    %c0_i32 = arith.constant 0 : i32
    %3 = arith.cmpi eq, %arg2, %c0_i32 : i32
    %4 = arith.extui %3 : i1 to i32
    %c0_i32_3 = arith.constant 0 : i32
    %5 = arith.cmpi ne, %4, %c0_i32_3 : i32
    scf.if %5 {
      %c0_6 = arith.constant 0 : index
      %c0_7 = arith.constant 0 : index
      %9 = vector.load %arg5[%c0_6, %c0_7] : memref<1x128xf32, #tpu.memory_space<vmem>>, vector<1x128xf32>
      %10 = vector.broadcast %9 : vector<1x128xf32> to vector<2x128xf32>
      %11 = arith.addf %2, %10 : vector<2x128xf32>
      %c0_8 = arith.constant 0 : index
      %c0_9 = arith.constant 0 : index
      %12 = vector.load %arg6[%c0_8, %c0_9] : memref<2x128xf32, #tpu.memory_space<vmem>>, vector<2x128xf32>
      tpu.vector_store %arg6[%c0_8, %c0_9], %11 {strides = array<i32>} : memref<2x128xf32, #tpu.memory_space<vmem>>, vector<2x128xf32>,
    } else {
    }
    %c0_i32_4 = arith.constant 0 : i32
    %6 = arith.cmpi sgt, %arg2, %c0_i32_4 : i32
    %7 = arith.extui %6 : i1 to i32
    %c0_i32_5 = arith.constant 0 : i32
    %8 = arith.cmpi ne, %7, %c0_i32_5 : i32
    scf.if %8 {
      %c0_6 = arith.constant 0 : index
      %c0_7 = arith.constant 0 : index
      %9 = vector.load %arg6[%c0_6, %c0_7] : memref<2x128xf32, #tpu.memory_space<vmem>>, vector<2x128xf32>
      %10 = arith.addf %9, %2 : vector<2x128xf32>
      %c0_8 = arith.constant 0 : index
      %c0_9 = arith.constant 0 : index
      %11 = vector.load %arg6[%c0_8, %c0_9] : memref<2x128xf32, #tpu.memory_space<vmem>>, vector<2x128xf32>
      tpu.vector_store %arg6[%c0_8, %c0_9], %10 {strides = array<i32>} : memref<2x128xf32, #tpu.memory_space<vmem>>, vector<2x128xf32>,
    } else {
    }
    return
  }
  func.func @transform_0(%arg0: i32, %arg1: i32, %arg2: i32) -> (i32, i32) {
    %c0_i32 = arith.constant 0 : i32
    return %arg0, %arg2 : i32, i32
  }
  func.func @transform_1(%arg0: i32, %arg1: i32, %arg2: i32) -> (i32, i32) {
    %c0_i32 = arith.constant 0 : i32
    return %arg2, %arg1 : i32, i32
  }
  func.func @transform_2(%arg0: i32, %arg1: i32, %arg2: i32) -> (i32, i32) {
    %c0_i32 = arith.constant 0 : i32
    %c0_i32_0 = arith.constant 0 : i32
    return %c0_i32, %arg1 : i32, i32
  }
  func.func @transform_3(%arg0: i32, %arg1: i32, %arg2: i32) -> (i32, i32) {
    %c0_i32 = arith.constant 0 : i32
    return %arg0, %arg1 : i32, i32
  }
}

</mosaic_0001>

<bundles_post_ra>
// kernel: tpu_custom_call.1
= control target key start
LH: loop header
LB: loop body
LE: loop exit
PB: predicated region body
PF: predicated region fallthrough
CT: control target
= control target key end

     0   :  { %8 = vsyncpa [#allocation3], 0  ;;  %s1190_s0 = inlined_call_operand.hbm [shape: bf16[2,1024], index: 0, kind: input, shape index: {}]   ;;  %s1191_s1 = inlined_call_operand.hbm [shape: bf16[1024,128], index: 1, kind: input, shape index: {}]   ;;  %s1192_s2 = inlined_call_operand.vmem [shape: f32[1,128], index: 2, kind: input, shape index: {}]   ;;  %s1193_s3 = inlined_call_operand.hbm [shape: f32[2,128], index: 3, kind: output, shape index: {}]  }
   0x1   :  { %9 = vsyncpa [#allocation6], 0 }
   0x2   :  { %10 = vsyncpa [#allocation4], 0  ;;  %s1105_s12 = smov [#allocation2]   ;;  %s1106_s14 = smov [#allocation5]  }
   0x3   :  { %s17_s13 = sshll.u32 %s1105_s12, 4  ;;  %s26_s15 = sshll.u32 %s1106_s14, 4  ;;  %s18_s13 = int_to_ptr.vmem [resolvable:$true] %s17_s13  ;;  %s1131_s15 = int_to_ptr.vmem [resolvable:$true] %s26_s15 }
   0x4   :  { %s1033_s18 = scalar_lea.hbm %s1190_s0, 128 }
   0x5   :  { %p1034_p0 = scmp.ne.s32.totalorder %s1190_s0, %s1033_s18  ;;  %p1037_p1 = scmp.lt.u32.totalorder %s1033_s18, %s1190_s0 }
   0x7   :  { %p1039_p2 = pnand %p1037_p1, %p1034_p0 }
   0x9   :  { %1042 = shalt.err (!%p1039_p2)
}
   0xa   :  { %s1043_s23 = scalar_lea.vmem %s18_s13, 128  ;;  %p1048_p4 = scmp.lt.s32.totalorder %s18_s13, %s18_s13 }
   0xb   :  { %p1044_p3 = scmp.ne.s32.totalorder %s18_s13, %s1043_s23  ;;  %p1049_p5 = scmp.lt.s32.totalorder %s1043_s23, %s1043_s23 }
   0xd   :  { %p1050_p6 = por %p1049_p5, %p1048_p4 }
   0xf   :  { %p1051_p7 = pnand %p1050_p6, %p1044_p3 }
  0x11   :  { %1054 = shalt.err (!%p1051_p7)
}
  0x12   :  { %20 = dma.hbm_to_vmem [thread:$0]  %s1190_s0, 128, %s18_s13, [#allocation3]  }
  0x13   :  { %s1055_s28 = scalar_lea.hbm %s1191_s1, 8192 }
  0x14   :  { %p1056_p8 = scmp.ne.s32.totalorder %s1191_s1, %s1055_s28  ;;  %p1059_p9 = scmp.lt.u32.totalorder %s1055_s28, %s1191_s1 }
  0x16   :  { %p1061_p10 = pnand %p1059_p9, %p1056_p8 }
  0x18   :  { %1064 = shalt.err (!%p1061_p10)
}
  0x19   :  { %s1065_s6 = scalar_lea.vmem %s1131_s15, 8192  ;;  %p1070_p12 = scmp.lt.s32.totalorder %s1131_s15, %s1131_s15 }
  0x1a   :  { %p1066_p11 = scmp.ne.s32.totalorder %s1131_s15, %s1065_s6  ;;  %p1071_p13 = scmp.lt.s32.totalorder %s1065_s6, %s1065_s6 }
  0x1c   :  { %p1072_p0 = por %p1071_p13, %p1070_p12 }
  0x1e   :  { %p1073_p1 = pnand %p1072_p0, %p1066_p11 }
  0x20   :  { %1076 = shalt.err (!%p1073_p1)
}
  0x21   :  { %s1107_s0 = smov 64   ;;  %s1108_s7 = smov 4  }
  0x22   :  { %32 = dma.hbm_to_vmem [thread:$0]  %s1191_s1, 8192, %s1131_s15, [#allocation6], %s1107_s0, %s1107_s0, %s1108_s7  }
  0x23   :  { %1099 = dma.done.wait [#allocation3], 128  }
  0x24   :  { %1100 = vsyncadd [#allocation3], 4294967168 }
  0x25   :  { %1101 = dma.done.wait [#allocation6], 8192  }
  0x26   :  { %1102 = vsyncadd [#allocation6], 4294959104  ;;  %v968_v0 = vld [vmem:[#allocation5 + $0x40] sm:$0xff]   ;;  %v972_v4 = vld [vmem:[#allocation5 + $0x48] sm:$0xff]   ;;  %v1109_v22 = vmov 1966171168   ;;  %v176_v24 = vlaneseq }
  0x27   :  { %v969_v1 = vld [vmem:[#allocation5 + $0xc0] sm:$0xff]   ;;  %874 = vmatprep.subr.bf16.mxu0 %v968_v0  ;;  %v973_v5 = vld [vmem:[#allocation5 + $0xc8] sm:$0xff]   ;;  %v976_v8 = vld [vmem:[#allocation5 + $0x50] sm:$0xff]   ;;  %v174_v23 = vunpack.c.l.s4 %v1109_v22  ;;  %s1110_s11 = smov [#allocation7]  }
  0x28   :  { %v970_v2 = vld [vmem:[#allocation5] sm:$0xff]   ;;  %896 = vmatprep.subr.bf16.mxu1 %v969_v1  ;;  %v974_v6 = vld [vmem:[#allocation5 + $0x8] sm:$0xff]   ;;  %v977_v9 = vld [vmem:[#allocation5 + $0xd0] sm:$0xff]   ;;  %v177_v30 = vshrl.u32 %v176_v24, 7  ;;  %s799_s12 = sshll.u32 %s1110_s11, 4  ;;  %s800_s12 = int_to_ptr.vmem [resolvable:$true] %s799_s12 }
  0x29   :  { %v971_v3 = vld [vmem:[#allocation5 + $0x80] sm:$0xff]   ;;  %875 = vmatpush3.bf16.msra.mxu0 %v970_v2  ;;  %v975_v7 = vld [vmem:[#allocation5 + $0x88] sm:$0xff]   ;;  %v978_v10 = vld [vmem:[#allocation5 + $0x10] sm:$0xff]   ;;  %v175_v29 = vunpack.c.0.s8 %v174_v23  ;;  %s1077_s13 = scalar_lea.vmem %s800_s12, 32  ;;  %p1082_p3 = scmp.lt.s32.totalorder %s800_s12, %s800_s12 }
  0x2a   :  { %897 = vmatpush3.bf16.msra.mxu1 %v971_v3  ;;  %876 = vmatprep.subr.bf16.mxu0 %v972_v4  ;;  %v979_v11 = vld [vmem:[#allocation5 + $0x90] sm:$0xff]   ;;  %v980_v12 = vld [vmem:[#allocation5 + $0x58] sm:$0xff]   ;;  %v984_v16 = vld [vmem:[#allocation5 + $0x60] sm:$0xff]   ;;  %p1078_p2 = scmp.ne.s32.totalorder %s800_s12, %s1077_s13  ;;  %p1083_p4 = scmp.lt.s32.totalorder %s1077_s13, %s1077_s13 }
  0x2b   :  { %898 = vmatprep.subr.bf16.mxu1 %v973_v5  ;;  %v981_v13 = vld [vmem:[#allocation5 + $0xd8] sm:$0xff]   ;;  %v985_v17 = vld [vmem:[#allocation5 + $0xe0] sm:$0xff]   ;;  %v988_v20 = vld [vmem:[#allocation5 + $0x68] sm:$0xff]   ;;  %v1162_v35 = vsub.s32 %v175_v29, %v177_v30 }
  0x2c   :  { %v982_v14 = vld [vmem:[#allocation5 + $0x18] sm:$0xff]   ;;  %v986_v18 = vld [vmem:[#allocation5 + $0x20] sm:$0xff]   ;;  %v989_v21 = vld [vmem:[#allocation5 + $0xe8] sm:$0xff]   ;;  %p1084_p5 = por %p1083_p4, %p1082_p3 }
  0x2d   :  { %877 = vmatpush3.bf16.msra.mxu0 %v974_v6  ;;  %v983_v15 = vld [vmem:[#allocation5 + $0x98] sm:$0xff]   ;;  %v987_v19 = vld [vmem:[#allocation5 + $0xa0] sm:$0xff]   ;;  %v990_v25 = vld [vmem:[#allocation5 + $0x28] sm:$0xff]  }
  0x2e   :  { %899 = vmatpush3.bf16.msra.mxu1 %v975_v7  ;;  %878 = vmatprep.subr.bf16.mxu0 %v976_v8  ;;  %v991_v26 = vld [vmem:[#allocation5 + $0xa8] sm:$0xff]   ;;  %v992_v27 = vld [vmem:[#allocation5 + $0x70] sm:$0xff]   ;;  %v996_v33 = vld [vmem:[#allocation5 + $0x78] sm:$0xff]   ;;  %p1085_p6 = pnand %p1084_p5, %p1078_p2 }
  0x2f   :  { %900 = vmatprep.subr.bf16.mxu1 %v977_v9  ;;  %v993_v28 = vld [vmem:[#allocation5 + $0xf0] sm:$0xff]   ;;  %v997_v34 = vld [vmem:[#allocation5 + $0xf8] sm:$0xff]   ;;  %v1001_v41 = vld [vmem:[#allocation5 + $0x140] sm:$0xff]  }
  0x30   :  { %v994_v31 = vld [vmem:[#allocation5 + $0x30] sm:$0xff]   ;;  %v998_v36 = vld [vmem:[#allocation5 + $0x38] sm:$0xff]   ;;  %v1002_v42 = vld [vmem:[#allocation5 + $0x1c0] sm:$0xff]  }
  0x31   :  { %879 = vmatpush3.bf16.msra.mxu0 %v978_v10  ;;  %v995_v32 = vld [vmem:[#allocation5 + $0xb0] sm:$0xff]   ;;  %v999_v37 = vld [vmem:[#allocation5 + $0xb8] sm:$0xff]   ;;  %v1003_v47 = vld [vmem:[#allocation5 + $0x100] sm:$0xff]  }
  0x32   :  { %901 = vmatpush3.bf16.msra.mxu1 %v979_v11  ;;  %880 = vmatprep.subr.bf16.mxu0 %v980_v12  ;;  %v42_v38 = vld [vmem:[#allocation2] sm:$0xff]  ;;  %v1005_v50 = vld [vmem:[#allocation5 + $0x148] sm:$0xff]   ;;  %v1004_v52 = vld [vmem:[#allocation5 + $0x180] sm:$0xff]  }
  0x33   :  { %902 = vmatprep.subr.bf16.mxu1 %v981_v13  ;;  %v172_v39 = vcombine.high %v42_v38, %v42_v38  ;;  %v179_v40 = vrot.slane %v42_v38, %v1162_v35  ;;  %v1006_v54 = vld [vmem:[#allocation5 + $0x1c8] sm:$0xff]   ;;  %v1009_v57 = vld [vmem:[#allocation5 + $0x150] sm:$0xff]   ;;  %v1013_v61 = vld [vmem:[#allocation5 + $0x158] sm:$0xff]  }
  0x34   :  { %v1007_v55 = vld [vmem:[#allocation5 + $0x108] sm:$0xff]   ;;  %v1010_v59 = vld [vmem:[#allocation5 + $0x1d0] sm:$0xff]   ;;  %v1014_v63 = vld [vmem:[#allocation5 + $0x1d8] sm:$0xff]  }
  0x35   :  { %881 = vmatpush3.bf16.msra.mxu0 %v982_v14  ;;  %v187_v43 = vcombine.high %v179_v40, %v179_v40  ;;  %v195_v44 = vrot.slane %v179_v40, %v1162_v35  ;;  %v1167_v45 = vrot.slane %v172_v39, %v1162_v35  ;;  %v1008_v58 = vld [vmem:[#allocation5 + $0x188] sm:$0xff]   ;;  %v1011_v60 = vld [vmem:[#allocation5 + $0x110] sm:$0xff]   ;;  %v1015_v0 = vld [vmem:[#allocation5 + $0x118] sm:$0xff]  }
  0x36   :  { %903 = vmatpush3.bf16.msra.mxu1 %v983_v15  ;;  %882 = vmatprep.subr.bf16.mxu0 %v984_v16  ;;  %v1012_v62 = vld [vmem:[#allocation5 + $0x190] sm:$0xff]   ;;  %v1017_v1 = vld [vmem:[#allocation5 + $0x160] sm:$0xff]   ;;  %v1016_v2 = vld [vmem:[#allocation5 + $0x198] sm:$0xff]  }
  0x37   :  { %904 = vmatprep.subr.bf16.mxu1 %v985_v17  ;;  %v209_v46 = vrot.slane %v187_v43, %v1162_v35  ;;  %v188_v48 = vcombine.high %v1167_v45, %v1167_v45  ;;  %v217_v49 = vcombine.high %v195_v44, %v195_v44  ;;  %v1018_v3 = vld [vmem:[#allocation5 + $0x1e0] sm:$0xff]   ;;  %v1021_v5 = vld [vmem:[#allocation5 + $0x168] sm:$0xff]   ;;  %v1025_v9 = vld [vmem:[#allocation5 + $0x170] sm:$0xff]   ;;  %v202_v17 = vrot.slane %v1167_v45, %v1162_v35 }
  0x38   :  { %v1019_v4 = vld [vmem:[#allocation5 + $0x120] sm:$0xff]   ;;  %v1022_v7 = vld [vmem:[#allocation5 + $0x1e8] sm:$0xff]   ;;  %v1026_v11 = vld [vmem:[#allocation5 + $0x1f0] sm:$0xff]  }
  0x39   :  { %883 = vmatpush3.bf16.msra.mxu0 %v986_v18  ;;  %645 = vmatprep.mubr.bf16.mxu0 %v209_v46  ;;  %v219_v51 = vcombine.high %v209_v46, %v209_v46  ;;  %v216_v53 = vrot.slane %v188_v48, %v1162_v35  ;;  %v1020_v6 = vld [vmem:[#allocation5 + $0x1a0] sm:$0xff]   ;;  %v1023_v8 = vld [vmem:[#allocation5 + $0x128] sm:$0xff]   ;;  %v1027_v12 = vld [vmem:[#allocation5 + $0x130] sm:$0xff]  }
  0x3a   :  { %905 = vmatpush3.bf16.msra.mxu1 %v987_v19  ;;  %884 = vmatprep.subr.bf16.mxu0 %v988_v20  ;;  %v1024_v10 = vld [vmem:[#allocation5 + $0x1a8] sm:$0xff]   ;;  %v1029_v13 = vld [vmem:[#allocation5 + $0x178] sm:$0xff]   ;;  %v1028_v14 = vld [vmem:[#allocation5 + $0x1b0] sm:$0xff]   ;;  %v218_v19 = vcombine.high %v202_v17, %v202_v17 }
  0x3b   :  { %906 = vmatprep.subr.bf16.mxu1 %v989_v21  ;;  %685 = vmatprep.mubr.bf16.mxu1 %v219_v51  ;;  %v220_v56 = vcombine.high %v216_v53, %v216_v53  ;;  %v1030_v15 = vld [vmem:[#allocation5 + $0x1f8] sm:$0xff]  }
  0x3c   :  { %v1031_v16 = vld [vmem:[#allocation5 + $0x138] sm:$0xff]  }
  0x3d   :  { %885 = vmatpush3.bf16.msra.mxu0 %v990_v25  ;;  %v1032_v18 = vld [vmem:[#allocation5 + $0x1b8] sm:$0xff]  }
  0x3e   :  { %907 = vmatpush3.bf16.msra.mxu1 %v991_v26  ;;  %886 = vmatprep.subr.bf16.mxu0 %v992_v27 }
  0x3f   :  { %908 = vmatprep.subr.bf16.mxu1 %v993_v28 }
  0x41   :  { %887 = vmatpush3.bf16.msra.mxu0 %v994_v31 }
  0x42   :  { %909 = vmatpush3.bf16.msra.mxu1 %v995_v32  ;;  %888 = vmatprep.subr.bf16.mxu0 %v996_v33 }
  0x43   :  { %910 = vmatprep.subr.bf16.mxu1 %v997_v34 }
  0x45   :  { %889 = vmatpush3.bf16.msra.mxu0 %v998_v36 }
  0x46   :  { %911 = vmatpush3.bf16.msra.mxu1 %v999_v37  ;;  %918 = vmatprep.subr.bf16.mxu0 %v1001_v41 }
  0x47   :  { %940 = vmatprep.subr.bf16.mxu1 %v1002_v42  ;;  %v873_v42 = vld [vmem:[%s1192_s2] ss:$0 sm:$0xff] }
  0x48   :  { %646 = vmatmul.mubr.bf16.vlgmr.msra.gmra.mrb[0].mxu0 %v195_v44 }
  0x49   :  { %919 = vmatpush3.bf16.msra.mxu0 %v1003_v47  ;;  %686 = vmatmul.mubr.bf16.vlgmr.msra.gmra.mrb[0].mxu1 %v217_v49 }
  0x4a   :  { %920 = vmatprep.subr.bf16.mxu0 %v1005_v50  ;;  %941 = vmatpush3.bf16.msra.mxu1 %v1004_v52 }
  0x4b   :  { %725 = vmatprep.mubr.bf16.mxu0 %v216_v53  ;;  %942 = vmatprep.subr.bf16.mxu1 %v1006_v54 }
  0x4c   :  { %765 = vmatprep.mubr.bf16.mxu1 %v220_v56 }
  0x4d   :  { %921 = vmatpush3.bf16.msra.mxu0 %v1007_v55 }
  0x4e   :  { %922 = vmatprep.subr.bf16.mxu0 %v1009_v57  ;;  %943 = vmatpush3.bf16.msra.mxu1 %v1008_v58 }
  0x4f   :  { %944 = vmatprep.subr.bf16.mxu1 %v1010_v59 }
  0x51   :  { %923 = vmatpush3.bf16.msra.mxu0 %v1011_v60 }
  0x52   :  { %924 = vmatprep.subr.bf16.mxu0 %v1013_v61  ;;  %945 = vmatpush3.bf16.msra.mxu1 %v1012_v62 }
  0x53   :  { %946 = vmatprep.subr.bf16.mxu1 %v1014_v63 }
  0x55   :  { %925 = vmatpush3.bf16.msra.mxu0 %v1015_v0 }
  0x56   :  { %926 = vmatprep.subr.bf16.mxu0 %v1017_v1  ;;  %947 = vmatpush3.bf16.msra.mxu1 %v1016_v2 }
  0x57   :  { %948 = vmatprep.subr.bf16.mxu1 %v1018_v3 }
  0x59   :  { %927 = vmatpush3.bf16.msra.mxu0 %v1019_v4 }
  0x5a   :  { %928 = vmatprep.subr.bf16.mxu0 %v1021_v5  ;;  %949 = vmatpush3.bf16.msra.mxu1 %v1020_v6 }
  0x5b   :  { %950 = vmatprep.subr.bf16.mxu1 %v1022_v7 }
  0x5d   :  { %929 = vmatpush3.bf16.msra.mxu0 %v1023_v8 }
  0x5e   :  { %930 = vmatprep.subr.bf16.mxu0 %v1025_v9  ;;  %951 = vmatpush3.bf16.msra.mxu1 %v1024_v10 }
  0x5f   :  { %952 = vmatprep.subr.bf16.mxu1 %v1026_v11 }
  0x61   :  { %931 = vmatpush3.bf16.msra.mxu0 %v1027_v12 }
  0x62   :  { %932 = vmatprep.subr.bf16.mxu0 %v1029_v13  ;;  %953 = vmatpush3.bf16.msra.mxu1 %v1028_v14 }
  0x63   :  { %954 = vmatprep.subr.bf16.mxu1 %v1030_v15 }
  0x65   :  { %933 = vmatpush3.bf16.msra.mxu0 %v1031_v16 }
  0x66   :  { %955 = vmatpush3.bf16.msra.mxu1 %v1032_v18 }
  0x68   :  { %726 = vmatmul.mubr.bf16.vlgmr.msra.gmra.mrb[4].mxu0 %v202_v17 }
  0x69   :  { %766 = vmatmul.mubr.bf16.vlgmr.msra.gmra.mrb[4].mxu1 %v218_v19 }
 0x11b   :  { %v890_v20 = vpop.f32.mrb[0].mxu0 }
 0x11c   :  { %v891_v21 = vpop.f32.mrb[1].mxu0  ;;  %v912_v22 = vpop.f32.mrb[0].mxu1 }
 0x11d   :  { %v892_v23 = vadd.f32 %v891_v21, %v890_v20  ;;  %v893_v24 = vpop.f32.mrb[2].mxu0  ;;  %v913_v25 = vpop.f32.mrb[1].mxu1 }
 0x11e   :  { %v894_v26 = vpop.f32.mrb[3].mxu0  ;;  %v914_v27 = vadd.f32 %v913_v25, %v912_v22  ;;  %v915_v28 = vpop.f32.mrb[2].mxu1 }
 0x11f   :  { %v916_v29 = vpop.f32.mrb[3].mxu1 }
 0x120   :  { %v688_v30 = vadd.f32 %v914_v27, %v892_v23 }
 0x13b   :  { %v934_v31 = vpop.f32.mrb[4].mxu0 }
 0x13c   :  { %v935_v32 = vpop.f32.mrb[5].mxu0  ;;  %v956_v33 = vpop.f32.mrb[4].mxu1 }
 0x13d   :  { %v936_v34 = vadd.f32 %v935_v32, %v934_v31  ;;  %v937_v35 = vpop.f32.mrb[6].mxu0  ;;  %v957_v36 = vpop.f32.mrb[5].mxu1 }
 0x13e   :  { %v938_v37 = vpop.f32.mrb[7].mxu0  ;;  %v958_v39 = vadd.f32 %v957_v36, %v956_v33  ;;  %v959_v40 = vpop.f32.mrb[6].mxu1 }
 0x13f   :  { %v728_v38 = vadd.f32 %v936_v34, %v688_v30  ;;  %v960_v41 = vpop.f32.mrb[7].mxu1 }
 0x141   :  { %v768_v43 = vadd.f32 %v958_v39, %v728_v38 }
 0x143   :  { %v784_v44 = vadd.f32 %v873_v42, %v768_v43 }
 0x145   :  { %785 = vst [vmem:[#allocation7] sm:$0x3] %v784_v44 }
 0x146   :  { %1088 = shalt.err (!%p1085_p6)
}
 0x147   :  { %s1089_s16 = scalar_lea.hbm %s1193_s3, 32 }
 0x148   :  { %p1090_p7 = scmp.ne.s32.totalorder %s1193_s3, %s1089_s16  ;;  %p1093_p8 = scmp.lt.u32.totalorder %s1089_s16, %s1193_s3 }
 0x14a   :  { %p1095_p9 = pnand %p1093_p8, %p1090_p7 }
 0x14c   :  { %1098 = shalt.err (!%p1095_p9)
}
 0x14d   :  { %802 = dma.vmem_to_hbm [thread:$0]  %s800_s12, 32, %s1193_s3, [#allocation4]  }
 0x14e   :  { %1103 = dma.done.wait [#allocation4], 32  }
 0x14f   :  { %1104 = vsyncadd [#allocation4], 4294967264 }
 0x150   :  { %806 = vsyncpa [#allocation3], 1 }
 0x151   :  { %807 = vsyncpa [#allocation6], 1 }
 0x152   :  { %808 = vsyncpa [#allocation4], 1 }

</bundles_post_ra>
